<compile_context>
chip_gen: v5e
topology: v5e:2x2
jax: 0.10.0
libtpu: 0.0.40
codegen_flags: <defaults>
</compile_context>

<pallas_src>
import jax
import jax.numpy as jnp
from jax.experimental import pallas as pl
from jax.experimental.pallas import tpu as pltpu


def _value_head_kernel_mxu(x_ref, w_ref, b_ref, o_ref):
    # x_ref: [TB, S] activations tile (VMEM)
    # w_ref: [S, 1]  weight column, grid-resident (VMEM)
    # b_ref: [1]     bias scalar (SMEM)
    # o_ref: [TB, 1] output tile (VMEM)
    x = x_ref[...]
    w = w_ref[...].astype(x.dtype)
    # MXU matmul with f32 accumulation; the otherwise-idle MXU keeps the kernel
    # DMA-bound for small S (XLU lane-reduce would bind on v7x's HBM BW).
    acc = jnp.dot(x, w, preferred_element_type=jnp.float32)          # [TB, 1] f32
    o_ref[...] = (acc + b_ref[0]).astype(o_ref.dtype)


def _value_head_kernel_vpu(x_ref, w_ref, b_ref, o_ref):
    # x_ref: [TB, S] activations tile (VMEM)
    # w_ref: [1, S]  lane-dense weight row, grid-resident (VMEM)
    # b_ref: [1]     bias scalar (SMEM)
    # o_ref: [TB, 1] output tile (VMEM)
    x = x_ref[...]
    w = w_ref[...].astype(x.dtype)          # bf16 multiply on v6e/v7x, f32 for f32 inputs
    # Multiply in the input dtype, accumulate the lane reduce in f32 (no full
    # [TB, S] f32 upcast materialized; reduce is strip-mined by Mosaic).
    acc = jnp.sum(x * w, axis=-1, keepdims=True, dtype=jnp.float32)  # [TB, 1] f32
    o_ref[...] = (acc + b_ref[0]).astype(o_ref.dtype)


def _round_up(x: int, m: int) -> int:
    return ((x + m - 1) // m) * m


def value_network_head(
    state: jax.Array,
    weight: jax.Array,
    bias: jax.Array,
    *,
    block_batch: int | None = None,
    vmem_limit_bytes: int = 32 << 20,
    mxu_threshold: int = 256,
) -> jax.Array:
    """state: [B, S]; weight: [1, S] (torch Linear layout); bias: [1] -> out [B, 1]."""
    B, S = state.shape
    out_dtype = state.dtype
    in_item = state.dtype.itemsize
    out_item = jnp.dtype(out_dtype).itemsize

    # --- batch tile selection -------------------------------------------------
    # VMEM per batch row with default double-buffering:
    #   2 * (S * itemsize)   input tile
    #   2 * 512              [TB, 1] output tile, lane-padded to 128 lanes (f32-conservative)
    # Keep the total under ~3/4 of the (explicit) 32 MiB scoped limit so the
    # weight tile + compiler scratch + any small intermediates fit everywhere
    # (v7x has only 64 MiB physical VMEM).
    if block_batch is None:
        usable = (min(vmem_limit_bytes, 32 << 20) * 3) // 4
        per_row = 2 * (S * in_item) + 2 * 512
        block_batch = max(8, (usable // per_row) // 8 * 8)
        if block_batch >= B and B >= 1024:
            # Guarantee >= 2 grid steps so the "parallel" axis can engage both
            # v7x TensorCores (a single-tile grid leaves one TC idle).
            block_batch = _round_up(-(-B // 2), 8)
    block_batch = max(8, (block_batch // 8) * 8)
    if block_batch >= B:
        block_batch = B          # single full block; exact array dim is always legal

    grid = (pl.cdiv(B, block_batch),)   # remainder block handled by Pallas masking

    # --- compute-path / weight layout selection -------------------------------
    use_mxu = S < mxu_threshold
    if use_mxu:
        w = weight.reshape(S, 1)        # MXU column: out = x @ w
        kernel = _value_head_kernel_mxu
    else:
        w = weight.reshape(1, S)        # lane-dense row: VPU multiply + XLU reduce
        kernel = _value_head_kernel_vpu
    b = bias.reshape(1).astype(jnp.float32)   # scalar for SMEM

    # TODO(synk): verify via a bundle dump that the remainder-block masking and the
    # strip-mined f32-accumulated reduce hold on the deployed JAX/Mosaic version.

    out = pl.pallas_call(
        kernel,
        out_shape=jax.ShapeDtypeStruct((B, 1), out_dtype),
        grid_spec=pltpu.PrefetchScalarGridSpec(
            num_scalar_prefetch=0,
            grid=grid,
            in_specs=[
                pl.BlockSpec((block_batch, S), lambda i: (i, 0)),    # activations tile
                pl.BlockSpec(w.shape, lambda i: (0, 0)),             # weight (grid-resident)
                pl.BlockSpec(memory_space=pltpu.MemorySpace.SMEM),   # bias scalar
            ],
            out_specs=pl.BlockSpec((block_batch, 1), lambda i: (i, 0)),
        ),
        compiler_params=pltpu.CompilerParams(
            # "parallel" shards batch tiles across v7x's 2 TensorCores; neutral on v5e/v6e.
            dimension_semantics=("parallel",),
            # Explicit limit: v5e's scoped default is only 16 MiB.
            vmem_limit_bytes=vmem_limit_bytes,
        ),
        cost_estimate=pl.CostEstimate(
            flops=2 * B * S,
            bytes_accessed=in_item * B * S
            + weight.size * weight.dtype.itemsize
            + out_item * B,
            transcendentals=0,
        ),
    )(state, w, b)

    return out


def init_params(state_space_size: int, key: jax.Array):
    """Deterministic init mirroring torch.nn.Linear default (U(-1/sqrt(in), 1/sqrt(in)))."""
    kw, kb = jax.random.split(key)
    bound = 1.0 / jnp.sqrt(jnp.float32(state_space_size))
    weight = jax.random.uniform(kw, (1, state_space_size), jnp.float32, -bound, bound)
    bias = jax.random.uniform(kb, (1,), jnp.float32, -bound, bound)
    return weight, bias


if __name__ == "__main__":
    key = jax.random.PRNGKey(0)
    k_x, k_p, k_x2, k_x3, k_p3 = jax.random.split(key, 5)

    batch = 8
    state_space_size = 32

    state = jax.random.normal(k_x, (batch, state_space_size), jnp.float32)
    weight, bias = init_params(state_space_size, k_p)

    # Small-S MXU path, single full block.
    out = jax.block_until_ready(value_network_head(state, weight, bias))
    ref = state @ weight.T + bias
    assert out.shape == (batch, 1)
    assert jnp.allclose(out, ref, atol=1e-5, rtol=1e-5)

    # Remainder-block path (no wrapper padding): B=20 with an 8-row tile ->
    # grid of 3, last block reads garbage rows whose output writes are masked.
    state2 = jax.random.normal(k_x2, (20, state_space_size), jnp.float32)
    out2 = jax.block_until_ready(
        value_network_head(state2, weight, bias, block_batch=8))
    ref2 = state2 @ weight.T + bias
    assert out2.shape == (20, 1)
    assert jnp.allclose(out2, ref2, atol=1e-5, rtol=1e-5)

    # Large-S VPU-multiply + f32-accumulated lane-reduce path.
    S3 = 512
    weight3, bias3 = init_params(S3, k_p3)
    state3 = jax.random.normal(k_x3, (16, S3), jnp.float32)
    out3 = jax.block_until_ready(value_network_head(state3, weight3, bias3))
    ref3 = state3 @ weight3.T + bias3
    assert out3.shape == (16, 1)
    assert jnp.allclose(out3, ref3, atol=1e-4, rtol=1e-4)

    print("KERNEL_OK")
</pallas_src>

<mosaic_0001>
module attributes {stable_mosaic.version = 11 : i64} {
  func.func @_value_head_kernel_mxu(%arg0: i32, %arg1: memref<8x32xf32, #tpu.memory_space<vmem>>, %arg2: memref<32x1xf32, #tpu.memory_space<vmem>>, %arg3: memref<1xf32, #tpu.memory_space<smem>>, %arg4: memref<8x1xf32, #tpu.memory_space<vmem>>) attributes {dimension_semantics = [#tpu.dimension_semantics<parallel>], iteration_bounds = array<i64: 1>, scalar_prefetch = 0 : i64, scratch_operands = 0 : i64, tpu.core_type = #tpu.core_type<tc>, window_params = [{transform_indices = @transform_0, window_bounds = array<i64: 8, 32>}, {pipeline_mode = #tpu.pipeline_mode<synchronous>, transform_indices = @transform_1, window_bounds = array<i64: 32, 1>}, {transform_indices = @transform_2, window_bounds = array<i64: 1>}, {transform_indices = @transform_3, window_bounds = array<i64: 8, 1>}]} {
    %c0 = arith.constant 0 : index
    %c0_0 = arith.constant 0 : index
    %0 = vector.load %arg1[%c0, %c0_0] : memref<8x32xf32, #tpu.memory_space<vmem>>, vector<8x32xf32>
    %c0_1 = arith.constant 0 : index
    %c0_2 = arith.constant 0 : index
    %1 = vector.load %arg2[%c0_1, %c0_2] : memref<32x1xf32, #tpu.memory_space<vmem>>, vector<32x1xf32>
    %cst = arith.constant dense<0.000000e+00> : vector<8x1xf32>
    %2 = tpu.matmul %0, %1, %cst {dimension_numbers = #tpu.dot_dimension_numbers<[1], [0], [0], [1], [0, 0, 1, 1], [], []>} : vector<8x32xf32>, vector<32x1xf32>, vector<8x1xf32> -> vector<8x1xf32>
    %c0_3 = arith.constant 0 : index
    %3 = memref.load %arg3[%c0_3] : memref<1xf32, #tpu.memory_space<smem>>
    %4 = vector.broadcast %3 : f32 to vector<8x1xf32>
    %5 = arith.addf %2, %4 : vector<8x1xf32>
    %c0_4 = arith.constant 0 : index
    %c0_5 = arith.constant 0 : index
    %6 = vector.load %arg4[%c0_4, %c0_5] : memref<8x1xf32, #tpu.memory_space<vmem>>, vector<8x1xf32>
    tpu.vector_store %arg4[%c0_4, %c0_5], %5 {strides = array<i32>} : memref<8x1xf32, #tpu.memory_space<vmem>>, vector<8x1xf32>,
    return
  }
  func.func @transform_0(%arg0: i32) -> (i32, i32) {
    %c0_i32 = arith.constant 0 : i32
    %c0_i32_0 = arith.constant 0 : i32
    return %arg0, %c0_i32 : i32, i32
  }
  func.func @transform_1(%arg0: i32) -> (i32, i32) {
    %c0_i32 = arith.constant 0 : i32
    %c0_i32_0 = arith.constant 0 : i32
    %c0_i32_1 = arith.constant 0 : i32
    return %c0_i32, %c0_i32_0 : i32, i32
  }
  func.func @transform_2(%arg0: i32) -> i32 {
    %c0_i32 = arith.constant 0 : i32
    %c0_i32_0 = arith.constant 0 : i32
    return %c0_i32 : i32
  }
  func.func @transform_3(%arg0: i32) -> (i32, i32) {
    %c0_i32 = arith.constant 0 : i32
    %c0_i32_0 = arith.constant 0 : i32
    return %arg0, %c0_i32 : i32, i32
  }
}

</mosaic_0001>

<bundles_post_ra>
// kernel: tpu_custom_call.1
= control target key start
LH: loop header
LB: loop body
LE: loop exit
PB: predicated region body
PF: predicated region fallthrough
CT: control target
= control target key end

     0   :  { %vm22_vm0 = vcmask 261120   ;;  %vm46_vm1 = vcmask 7168   ;;  %s94_s1 = inlined_call_operand.vmem [shape: f32[32,1], index: 1, kind: input, shape index: {}]   ;;  %s95_s0 = inlined_call_operand.vmem [shape: f32[8,32], index: 0, kind: input, shape index: {}]   ;;  %s96_s2 = inlined_call_operand.<no memory space> [shape: f32[1], index: 2, kind: input, shape index: {}]   ;;  %s97_s3 = inlined_call_operand.vmem [shape: f32[8,1], index: 3, kind: output, shape index: {}]  }
   0x1   :  { %v19_v0 = vld [vmem:[%s94_s1 + $0x18] sm:$0xff]  ;;  %v18_v1 = vld [vmem:[%s94_s1 + $0x10] sm:$0xff]  ;;  %v17_v2 = vld [vmem:[%s94_s1 + $0x8] sm:$0xff]  ;;  %v21_v5 = vstv %s96_s2 }
   0x2   :  { %38 = vmatpush.msra.mxu0 %v19_v0  ;;  %v16_v3 = vld [vmem:[%s94_s1] sm:$0xff] }
   0x3   :  { %v15_v4 = vld [vmem:[%s95_s0] sm:$0xff] }
   0x4   :  { %39 = vmatpush.msra.mxu0 %v18_v1 }
   0x6   :  { %40 = vmatpush.msra.mxu0 %v17_v2 }
   0x8   :  { %41 = vmatpush.msra.mxu0 %v16_v3 }
   0x9   :  { %52 = vmatmul.msk.f32.vlgmr.msra.gmra.mxu0 %vm22_vm0, %v15_v4 }
  0x86   :  { %v43_v6 = vpop.f32.mrf.mxu0 }
  0x87   :  { %v44_v7 = vadd.f32 %v43_v6, %v21_v5 }
  0x89   :  { %47 = vst.msk [vmem:[%s97_s3] sm:$0xff] %vm46_vm1, %v44_v7 }

</bundles_post_ra>
